<compile_context>
chip_gen: v7x
topology: tpu7x:2x2x1
jax: 0.10.0
libtpu: 0.0.40
codegen_flags: <defaults>
</compile_context>

<pallas_src>
import functools

import jax
import jax.numpy as jnp
from jax.experimental import pallas as pl
from jax.experimental.pallas import tpu as pltpu


def _vq_kernel(x_ref, cb_ref, bias_ref, *rest, scale, neg_xc, dist_dtype,
               gather_dtype, has_cb_mm):
    # x_ref    : VMEM (Gb, Nt, D)
    # cb_ref   : VMEM (Gb, K, D)        raw (unscaled) codebook, resident across N tiles
    # bias_ref : VMEM (Gb, 1, M=Gb*K)   |s|/2*||c||^2 merged per block, +inf cross-group
    # cb_mm_ref: VMEM (Gb, K, D)        codebook pre-cast to dist_dtype (only if needed)
    # out_ref  : VMEM (Gb, Nt, D)
    if has_cb_mm:
        cb_mm_ref, out_ref = rest
    else:
        (out_ref,) = rest
        cb_mm_ref = cb_ref

    x = x_ref[...]                                   # (Gb, Nt, D)
    gb, nt, d = x.shape
    m = bias_ref.shape[-1]                           # Gb * K (merged, lane-dense code axis)
    rows = gb * nt

    # Distance matmul on the MXU: groups merged into a single (rows, M) product so
    # the contraction is one matmul and downstream elementwise work is lane-dense.
    x2 = x.reshape(rows, d)
    if x2.dtype != dist_dtype:
        x2 = x2.astype(dist_dtype)
    cb_mm = cb_mm_ref[...].reshape(m, d)
    xc = jax.lax.dot_general(x2, cb_mm, (((1,), (1,)), ((), ())),
                             preferred_element_type=jnp.float32)     # (rows, M)
    xc = xc.reshape(gb, nt, m)

    # Distance proxy (argmin-equivalent to the true distance):
    #   s > 0: dist = (s/2)||c||^2 - x.c ;  s <= 0: dist = (|s|/2)||c||^2 + x.c
    # The bias already carries the scale and the +inf cross-group mask.
    bias = bias_ref[...]                             # (Gb, 1, M) f32
    dist = bias - xc if neg_xc else bias + xc        # (Gb, Nt, M)

    # First-minimum index per row (torch.argmin tie-break).  NaN distances select
    # no code and emit a zero row (benign divergence from torch's NaN argmin).
    min_d = jnp.min(dist, axis=-1, keepdims=True)                    # (Gb, Nt, 1)
    iota = jax.lax.broadcasted_iota(jnp.int32, (1, 1, m), 2)
    idx = jnp.min(jnp.where(dist <= min_d, iota, m),
                  axis=-1, keepdims=True)                            # (Gb, Nt, 1)

    # Gather the selected codebook rows via a one-hot matmul on the MXU.  For bf16
    # codebooks the operands are bf16 (exact 0/1 weights, single-pass matmul).
    one_hot = (iota == idx).astype(gather_dtype)                     # (Gb, Nt, M)
    cb_g = cb_ref[...].reshape(m, d)
    if cb_g.dtype != gather_dtype:
        cb_g = cb_g.astype(gather_dtype)
    xq = jax.lax.dot_general(one_hot.reshape(rows, m), cb_g,
                             (((1,), (0,)), ((), ())),
                             preferred_element_type=jnp.float32)     # (rows, D)
    xq = (scale * xq).reshape(gb, nt, d)
    out_ref[...] = xq.astype(out_ref.dtype)


def _vmem_plan():
    """Generation-aware VMEM planning: (tile-picker budget, scoped VMEM limit)."""
    try:   # environment probe only (not error hiding); fall back off-TPU / old jax
        cap = int(pltpu.get_tpu_info().vmem_capacity_bytes)
    except Exception:
        cap = 64 * 1024 * 1024                      # v7x-sized conservative fallback
    limit = min((cap * 3) // 4, 96 * 1024 * 1024)   # scoped limit handed to Mosaic
    budget = max(8 * 1024 * 1024, min((cap * 3) // 8, 48 * 1024 * 1024))
    return budget, limit                             # v6e/v5e: 48/96 MiB, v7x: 24/48 MiB


def _pick_tiles(G, N, K, D, *, x_it, cb_it, out_it, dist_it, gather_it,
                has_cb_mm, budget):
    """Pick (Gb groups, Nt rows) per grid step under a lane-padded VMEM model."""
    def pad(v, m):
        return -(-v // m) * m

    def est(gb, nt):
        dpad, mpad = pad(D, 128), pad(gb * K, 128)
        rpad = pad(gb * nt, 8)
        b = 2 * gb * pad(nt, 8) * dpad * x_it            # x block (double-buffered)
        b += 2 * gb * pad(K, 8) * dpad * cb_it           # codebook block (resident)
        if has_cb_mm:
            b += 2 * gb * pad(K, 8) * dpad * dist_it     # pre-cast codebook copy
        b += 2 * gb * 8 * mpad * 4                       # masked bias block
        b += 2 * gb * pad(nt, 8) * dpad * out_it         # output block
        if x_it != dist_it:
            b += rpad * dpad * dist_it                   # x cast temporary
        b += rpad * mpad * (4 + 4 + gather_it)           # xc + dist + one-hot
        b += rpad * dpad * 4                             # gathered rows (f32 acc)
        return b

    nt_opts = [n for n in range(N, 0, -1) if N % n == 0 and (n == N or n % 8 == 0)]
    div_g = [d for d in range(1, G + 1) if G % d == 0]
    # Smallest group block that makes the merged code axis lane-dense (Gb*K % 128
    # == 0) without blowing up the merged matmul width; else keep Gb small.
    lane_ok = [d for d in div_g if (d * K) % 128 == 0 and d * K <= 4096 and K % 8 == 0]
    gb_order = ([lane_ok[0]] if lane_ok else []) + \
               [d for d in div_g if not lane_ok or d != lane_ok[0]]
    for gb in gb_order:
        for nt in nt_opts:
            if est(gb, nt) <= budget:
                return gb, nt
    # Nothing fits the planning budget: smallest tile, rely on the raised scoped limit.
    # TODO(synk): add a K grid axis ("arbitrary") with an online (min, argmin)
    # accumulator for very large num_code instead of relying on the VMEM limit.
    return 1, nt_opts[-1]


def vector_quantize(x, codebook, scale, *, dist_dtype=None, vmem_budget_bytes=None):
    """Pallas equivalent of VectorQuantizer.forward.

    x:        (*code_group, N, code_dim)
    codebook: (*code_group, num_code, code_dim)  (raw; scaled inside the kernel)
    scale:    static Python/NumPy scalar (module buffer, treated as a hyperparameter)
    dist_dtype: distance-matmul operand dtype; None -> f32 for code_dim < 128
                (exact), bf16 otherwise.
    """
    *code_group, N, D = x.shape
    *cg2, K, D2 = codebook.shape
    if tuple(code_group) != tuple(cg2) or D != D2:
        raise ValueError("x / codebook shape mismatch")
    scale = float(scale)            # sign/value needed at trace time

    G = 1
    for g in code_group:
        G *= int(g)
    out_dtype = codebook.dtype

    if dist_dtype is None:
        # Small code_dim: the MXU is nowhere near the bottleneck -> keep distances
        # exact in f32 (and skip all operand casts).  bf16 only pays off for wide codes.
        dist_dtype = jnp.float32 if D < 128 else jnp.bfloat16
    dist_dtype = jnp.dtype(dist_dtype)
    gather_dtype = (jnp.dtype(jnp.bfloat16) if out_dtype == jnp.bfloat16
                    else jnp.dtype(jnp.float32))
    has_cb_mm = dist_dtype != jnp.dtype(codebook.dtype)

    budget, vmem_limit = _vmem_plan()
    if vmem_budget_bytes is not None:
        budget = int(vmem_budget_bytes)

    Gb, Nt = _pick_tiles(G, N, K, D,
                         x_it=x.dtype.itemsize, cb_it=codebook.dtype.itemsize,
                         out_it=jnp.dtype(out_dtype).itemsize,
                         dist_it=dist_dtype.itemsize, gather_it=gather_dtype.itemsize,
                         has_cb_mm=has_cb_mm, budget=budget)

    # v7x has 2 TensorCores sharded over "parallel" grid axes: for non-trivial
    # problems keep at least one axis at >= 2 steps so both cores get work.
    if G // Gb == 1 and N // Nt == 1 and G * N * D >= (1 << 15):
        half = [n for n in range(Nt // 2, 0, -1) if N % n == 0 and n % 8 == 0]
        if half:
            Nt = half[0]

    M = Gb * K
    grid = (G // Gb, N // Nt)

    xg = x.reshape(G, N, D)
    cbg = codebook.reshape(G, K, D)

    # Hoisted codebook-only precompute (tiny one-time XLA ops, reused by every
    # grid step): bias[g, k] = |scale|/2 * ||codebook[g, k]||^2, laid out over the
    # merged Gb*K code axis with +inf on cross-group columns.
    cb32 = cbg.astype(jnp.float32)
    bias = (0.5 * abs(scale)) * jnp.sum(cb32 * cb32, axis=-1)          # (G, K)
    if Gb > 1:
        pos = (jnp.arange(G, dtype=jnp.int32) % Gb)[:, None]           # group slot in block
        col = (jnp.arange(M, dtype=jnp.int32) // K)[None, :]           # column's group slot
        bias = jnp.where(col == pos, jnp.tile(bias, (1, Gb)), jnp.inf)  # (G, M)
    bias = bias[:, None, :]                                             # (G, 1, M)

    inputs = [xg, cbg, bias]
    in_specs = [
        pl.BlockSpec((Gb, Nt, D), lambda g, n: (g, n, 0)),    # x tile
        pl.BlockSpec((Gb, K, D), lambda g, n: (g, 0, 0)),     # codebook (resident across N)
        pl.BlockSpec((Gb, 1, M), lambda g, n: (g, 0, 0)),     # masked bias (resident)
    ]
    if has_cb_mm:
        inputs.append(cbg.astype(dist_dtype))                 # hoisted cast for the MXU
        in_specs.append(pl.BlockSpec((Gb, K, D), lambda g, n: (g, 0, 0)))

    kernel = functools.partial(
        _vq_kernel, scale=scale, neg_xc=scale > 0, dist_dtype=dist_dtype,
        gather_dtype=gather_dtype, has_cb_mm=has_cb_mm)

    out = pl.pallas_call(
        kernel,
        out_shape=jax.ShapeDtypeStruct((G, N, D), out_dtype),
        grid_spec=pltpu.PrefetchScalarGridSpec(
            num_scalar_prefetch=0,
            grid=grid,
            in_specs=in_specs,
            out_specs=pl.BlockSpec((Gb, Nt, D), lambda g, n: (g, n, 0)),
        ),
        compiler_params=pltpu.CompilerParams(
            dimension_semantics=("parallel", "parallel"),
            vmem_limit_bytes=vmem_limit),
    )(*inputs)
    return out.reshape(*code_group, N, D)


def _reference(x, codebook, scale):
    """Pure-JAX mirror of the PyTorch VectorQuantizer.forward."""
    cb = codebook * scale
    dist = (jnp.sum(x * x, axis=-1)[..., :, None]
            + jnp.sum(cb * cb, axis=-1)[..., None, :]
            - 2.0 * jnp.einsum("...nd,...kd->...nk", x, cb))
    idx = jnp.argmin(dist, axis=-1)
    return jnp.take_along_axis(cb, idx[..., None], axis=-2)


if __name__ == "__main__":
    # VectorQuantizer(shape=(2, 64, 32), scale=0.5): code_group=(2,), num_code=64, code_dim=32
    key = jax.random.PRNGKey(0)
    k_cb, k_x, k_x2 = jax.random.split(key, 3)

    code_group, num_code, code_dim = (2,), 64, 32
    N = 16
    scale = 0.5

    codebook = jax.random.normal(k_cb, (*code_group, num_code, code_dim), dtype=jnp.float32)
    x = jax.random.normal(k_x, (*code_group, N, code_dim), dtype=jnp.float32)

    # 1) Default path: code_dim < 128 -> f32 distances (exact); must match the reference.
    x_q = jax.block_until_ready(vector_quantize(x, codebook, scale))
    x_q_ref = _reference(x, codebook, scale)
    assert x_q.shape == x.shape and x_q.dtype == codebook.dtype
    assert jnp.allclose(x_q, x_q_ref, atol=1e-5, rtol=1e-5), "default path mismatch vs reference"

    # 2) Multi-step grid (codebook/bias stay VMEM-resident across N tiles): force a
    #    tiny tile-planning budget so the N axis splits, and check against the reference.
    N2 = 64
    x2 = jax.random.normal(k_x2, (*code_group, N2, code_dim), dtype=jnp.float32)
    x2_q = jax.block_until_ready(
        vector_quantize(x2, codebook, scale, vmem_budget_bytes=300 * 1024))
    assert jnp.allclose(x2_q, _reference(x2, codebook, scale), atol=1e-5, rtol=1e-5), \
        "multi-step grid mismatch vs reference"

    # 3) bf16 distance path (exercises the hoisted codebook-cast input): every output
    #    row must be an actual scaled codebook row with a (near-)optimal distance.
    x_q_bf = jax.block_until_ready(
        vector_quantize(x, codebook, scale, dist_dtype=jnp.bfloat16))
    cb_s = codebook * scale
    d_sel = jnp.sum((x - x_q_bf) ** 2, axis=-1)
    d_min = jnp.min(jnp.sum((x[..., :, None, :] - cb_s[..., None, :, :]) ** 2, axis=-1), axis=-1)
    is_row = jnp.any(jnp.all(jnp.isclose(x_q_bf[..., :, None, :], cb_s[..., None, :, :],
                                         atol=1e-5, rtol=1e-5), axis=-1), axis=-1)
    assert x_q_bf.shape == x.shape and x_q_bf.dtype == codebook.dtype
    assert bool(jnp.all(is_row)), "bf16 path emitted a non-codebook row"
    assert bool(jnp.all(d_sel <= d_min + 0.25)), "bf16 path picked a far-from-optimal code"

    print("KERNEL_OK")
</pallas_src>

<mosaic_0001>
module attributes {stable_mosaic.version = 11 : i64} {
  func.func @_vq_kernel(%arg0: i32, %arg1: i32, %arg2: memref<2x16x32xf32, #tpu.memory_space<vmem>>, %arg3: memref<2x64x32xf32, #tpu.memory_space<vmem>>, %arg4: memref<2x1x128xf32, #tpu.memory_space<vmem>>, %arg5: memref<2x16x32xf32, #tpu.memory_space<vmem>>) attributes {dimension_semantics = [#tpu.dimension_semantics<parallel>, #tpu.dimension_semantics<parallel>], iteration_bounds = array<i64: 1, 1>, scalar_prefetch = 0 : i64, scratch_operands = 0 : i64, tpu.core_type = #tpu.core_type<tc>, window_params = [{transform_indices = @transform_0, window_bounds = array<i64: 2, 16, 32>}, {transform_indices = @transform_1, window_bounds = array<i64: 2, 64, 32>}, {transform_indices = @transform_2, window_bounds = array<i64: 2, 1, 128>}, {transform_indices = @transform_3, window_bounds = array<i64: 2, 16, 32>}]} {
    %c0 = arith.constant 0 : index
    %c0_0 = arith.constant 0 : index
    %c0_1 = arith.constant 0 : index
    %0 = vector.load %arg2[%c0, %c0_0, %c0_1] : memref<2x16x32xf32, #tpu.memory_space<vmem>>, vector<2x16x32xf32>
    %1 = vector.shape_cast %0 : vector<2x16x32xf32> to vector<32x32xf32>
    %c0_2 = arith.constant 0 : index
    %c0_3 = arith.constant 0 : index
    %c0_4 = arith.constant 0 : index
    %2 = vector.load %arg3[%c0_2, %c0_3, %c0_4] : memref<2x64x32xf32, #tpu.memory_space<vmem>>, vector<2x64x32xf32>
    %3 = vector.shape_cast %2 : vector<2x64x32xf32> to vector<128x32xf32>
    %cst = arith.constant dense<0.000000e+00> : vector<32x128xf32>
    %4 = tpu.matmul %1, %3, %cst {dimension_numbers = #tpu.dot_dimension_numbers<[1], [1], [0], [0], [0, 0, 1, 0], [], []>} : vector<32x32xf32>, vector<128x32xf32>, vector<32x128xf32> -> vector<32x128xf32>
    %5 = vector.shape_cast %4 : vector<32x128xf32> to vector<2x16x128xf32>
    %c0_5 = arith.constant 0 : index
    %c0_6 = arith.constant 0 : index
    %c0_7 = arith.constant 0 : index
    %6 = vector.load %arg4[%c0_5, %c0_6, %c0_7] : memref<2x1x128xf32, #tpu.memory_space<vmem>>, vector<2x1x128xf32>
    %7 = vector.broadcast %6 : vector<2x1x128xf32> to vector<2x16x128xf32>
    %8 = arith.subf %7, %5 : vector<2x16x128xf32>
    %cst_8 = arith.constant dense<0x7F800000> : vector<2x16xf32>
    %9 = vector.multi_reduction <minimumf>, %8, %cst_8 [2] : vector<2x16x128xf32> to vector<2x16xf32>
    %10 = vector.shape_cast %9 : vector<2x16xf32> to vector<2x16x1xf32>
    %11 = tpu.iota {dimensions = array<i32: 2>} : vector<1x1x128xi32>
    %12 = vector.broadcast %10 : vector<2x16x1xf32> to vector<2x16x128xf32>
    %13 = arith.cmpf ole, %8, %12 : vector<2x16x128xf32>
    %c128_i32 = arith.constant 128 : i32
    %14 = vector.shape_cast %11 : vector<1x1x128xi32> to vector<1x1x128xi32>
    %15 = vector.broadcast %14 : vector<1x1x128xi32> to vector<2x16x128xi32>
    %16 = vector.broadcast %c128_i32 : i32 to vector<2x16x128xi32>
    %17 = arith.select %13, %15, %16 : vector<2x16x128xi1>, vector<2x16x128xi32>
    %cst_9 = arith.constant dense<2147483647> : vector<2x16xi32>
    %18 = vector.multi_reduction <minsi>, %17, %cst_9 [2] : vector<2x16x128xi32> to vector<2x16xi32>
    %19 = vector.shape_cast %18 : vector<2x16xi32> to vector<2x16x1xi32>
    %20 = vector.broadcast %11 : vector<1x1x128xi32> to vector<2x16x128xi32>
    %21 = vector.broadcast %19 : vector<2x16x1xi32> to vector<2x16x128xi32>
    %22 = arith.cmpi eq, %20, %21 : vector<2x16x128xi32>
    %23 = arith.extui %22 : vector<2x16x128xi1> to vector<2x16x128xi32>
    %24 = arith.sitofp %23 : vector<2x16x128xi32> to vector<2x16x128xf32>
    %c0_10 = arith.constant 0 : index
    %c0_11 = arith.constant 0 : index
    %c0_12 = arith.constant 0 : index
    %25 = vector.load %arg3[%c0_10, %c0_11, %c0_12] : memref<2x64x32xf32, #tpu.memory_space<vmem>>, vector<2x64x32xf32>
    %26 = vector.shape_cast %25 : vector<2x64x32xf32> to vector<128x32xf32>
    %27 = vector.shape_cast %24 : vector<2x16x128xf32> to vector<32x128xf32>
    %cst_13 = arith.constant dense<0.000000e+00> : vector<32x32xf32>
    %28 = tpu.matmul %27, %26, %cst_13 {dimension_numbers = #tpu.dot_dimension_numbers<[1], [0], [0], [1], [0, 0, 1, 1], [], []>} : vector<32x128xf32>, vector<128x32xf32>, vector<32x32xf32> -> vector<32x32xf32>
    %cst_14 = arith.constant 5.000000e-01 : f32
    %29 = vector.broadcast %cst_14 : f32 to vector<32x32xf32>
    %30 = arith.mulf %29, %28 : vector<32x32xf32>
    %31 = vector.shape_cast %30 : vector<32x32xf32> to vector<2x16x32xf32>
    %c0_15 = arith.constant 0 : index
    %c0_16 = arith.constant 0 : index
    %c0_17 = arith.constant 0 : index
    %32 = vector.load %arg5[%c0_15, %c0_16, %c0_17] : memref<2x16x32xf32, #tpu.memory_space<vmem>>, vector<2x16x32xf32>
    tpu.vector_store %arg5[%c0_15, %c0_16, %c0_17], %31 {strides = array<i32>} : memref<2x16x32xf32, #tpu.memory_space<vmem>>, vector<2x16x32xf32>,
    return
  }
  func.func @transform_0(%arg0: i32, %arg1: i32) -> (i32, i32, i32) {
    %c0_i32 = arith.constant 0 : i32
    %c0_i32_0 = arith.constant 0 : i32
    return %arg0, %arg1, %c0_i32 : i32, i32, i32
  }
  func.func @transform_1(%arg0: i32, %arg1: i32) -> (i32, i32, i32) {
    %c0_i32 = arith.constant 0 : i32
    %c0_i32_0 = arith.constant 0 : i32
    %c0_i32_1 = arith.constant 0 : i32
    return %arg0, %c0_i32, %c0_i32_0 : i32, i32, i32
  }
  func.func @transform_2(%arg0: i32, %arg1: i32) -> (i32, i32, i32) {
    %c0_i32 = arith.constant 0 : i32
    %c0_i32_0 = arith.constant 0 : i32
    %c0_i32_1 = arith.constant 0 : i32
    return %arg0, %c0_i32, %c0_i32_0 : i32, i32, i32
  }
  func.func @transform_3(%arg0: i32, %arg1: i32) -> (i32, i32, i32) {
    %c0_i32 = arith.constant 0 : i32
    %c0_i32_0 = arith.constant 0 : i32
    return %arg0, %arg1, %c0_i32 : i32, i32, i32
  }
}

</mosaic_0001>

<bundles_post_ra>
// kernel: tpu_custom_call.1
= control target key start
LH: loop header
LB: loop body
LE: loop exit
PB: predicated region body
PF: predicated region fallthrough
CT: control target
= control target key end

     0   :  { %vm35_vm0 = vcmask 261120   ;;  %s806_s0 = inlined_call_operand.vmem [shape: f32[2,16,32], index: 0, kind: input, shape index: {}]   ;;  %s807_s1 = inlined_call_operand.vmem [shape: f32[2,64,32], index: 1, kind: input, shape index: {}]   ;;  %s808_s2 = inlined_call_operand.vmem [shape: f32[2,1,128], index: 2, kind: input, shape index: {}]   ;;  %s809_s3 = inlined_call_operand.hbm [shape: f32[2,16,32], index: 3, kind: output, shape index: {}]  }
   0x1   :  { %v19_v0 = vld [vmem:[%s807_s1] sm:$0xff]  ;;  %v20_v1 = vld [vmem:[%s807_s1 + $0x8] sm:$0xff]  ;;  %v21_v2 = vld [vmem:[%s807_s1 + $0x10] sm:$0xff] }
   0x2   :  { %v540_v3 = vpack.c.bf16 %v20_v1, %v19_v0  ;;  %vm683_vm1 = vmpackc.low %vm35_vm0, %vm35_vm0  ;;  %v22_v5 = vld [vmem:[%s807_s1 + $0x18] sm:$0xff]  ;;  %v23_v7 = vld [vmem:[%s807_s1 + $0x20] sm:$0xff] }
   0x3   :  { %v546_v6 = vpack.c.bf16 %v22_v5, %v21_v2  ;;  %v24_v8 = vld [vmem:[%s807_s1 + $0x28] sm:$0xff]  ;;  %v15_v9 = vld [vmem:[%s806_s0] sm:$0xff] }
   0x4   :  { %542 = vmatprep.subr.msk.bf16.mxu0 %vm683_vm1, %v540_v3  ;;  %589 = vmatprep.subr.bf16.mxu1 %v540_v3  ;;  %v552_v10 = vpack.c.bf16 %v24_v8, %v23_v7 }
   0x5   :  { %545 = vmatpush3.bf16.xpose.msk.msra.mxu0 %vm683_vm1, %v540_v3  ;;  %591 = vmatpush3.bf16.msra.mxu1 %v540_v3 }
   0x6   :  { %548 = vmatprep.subr.msk.bf16.mxu0 %vm683_vm1, %v546_v6  ;;  %593 = vmatprep.subr.bf16.mxu1 %v546_v6 }
   0x7   :  { %496 = vmatprep.mubr.msk.f32.mxu0 %vm35_vm0, %v15_v9 }
   0x8   :  { %8 = vsyncpa [#allocation3], 0  ;;  %v25_v11 = vld [vmem:[%s807_s1 + $0x30] sm:$0xff]  ;;  %v26_v12 = vld [vmem:[%s807_s1 + $0x38] sm:$0xff]  ;;  %v207_v39 = vlaneseq }
   0x9   :  { %595 = vmatpush3.bf16.msra.mxu1 %v546_v6  ;;  %v558_v13 = vpack.c.bf16 %v26_v12, %v25_v11  ;;  %v27_v14 = vld [vmem:[%s807_s1 + $0x40] sm:$0xff]  ;;  %v28_v15 = vld [vmem:[%s807_s1 + $0x48] sm:$0xff]  ;;  %v29_v17 = vld [vmem:[%s807_s1 + $0x50] sm:$0xff] }
   0xa   :  { %597 = vmatprep.subr.bf16.mxu1 %v552_v10  ;;  %v564_v16 = vpack.c.bf16 %v28_v15, %v27_v14  ;;  %v30_v18 = vld [vmem:[%s807_s1 + $0x58] sm:$0xff]  ;;  %v31_v20 = vld [vmem:[%s807_s1 + $0x60] sm:$0xff]  ;;  %v32_v21 = vld [vmem:[%s807_s1 + $0x68] sm:$0xff]  ;;  %v780_v40 = vand.u32 127, %v207_v39 }
   0xb   :  { %v570_v19 = vpack.c.bf16 %v30_v18, %v29_v17  ;;  %v576_v22 = vpack.c.bf16 %v32_v21, %v31_v20  ;;  %v33_v23 = vld [vmem:[%s807_s1 + $0x70] sm:$0xff]  ;;  %v34_v24 = vld [vmem:[%s807_s1 + $0x78] sm:$0xff]  ;;  %v16_v26 = vld [vmem:[%s806_s0 + $0x8] sm:$0xff] }
   0xc   :  { %v582_v25 = vpack.c.bf16 %v34_v24, %v33_v23  ;;  %v17_v27 = vld [vmem:[%s806_s0 + $0x10] sm:$0xff]  ;;  %v18_v28 = vld [vmem:[%s806_s0 + $0x18] sm:$0xff]  ;;  %v414_v29 = vld [vmem:[%s808_s2] ss:$0 sm:$0xff]  ;;  %v648_v23 = vmov 1.0   ;;  %s649_s0 = smov [#allocation2]  }
   0xd   :  { %551 = vmatpush3.bf16.xpose.msk.msra.mxu0 %vm683_vm1, %v546_v6  ;;  %599 = vmatpush3.bf16.msra.mxu1 %v552_v10  ;;  %v415_v33 = vld [vmem:[%s808_s2 + $0x1] ss:$0 sm:$0xff]  ;;  %s383_s2 = sshll.u32 %s649_s0, 4  ;;  %s384_s2 = int_to_ptr.vmem [resolvable:$true] %s383_s2 }
   0xe   :  { %554 = vmatprep.subr.msk.bf16.mxu0 %vm683_vm1, %v552_v10  ;;  %601 = vmatprep.subr.bf16.mxu1 %v558_v13  ;;  %s624_s28 = scalar_lea.vmem %s384_s2, 512  ;;  %p629_p1 = scmp.lt.s32.totalorder %s384_s2, %s384_s2 }
   0xf   :  { %p625_p0 = scmp.ne.s32.totalorder %s384_s2, %s624_s28  ;;  %p630_p2 = scmp.lt.s32.totalorder %s624_s28, %s624_s28 }
  0x11   :  { %603 = vmatpush3.bf16.msra.mxu1 %v558_v13  ;;  %p631_p3 = por %p630_p2, %p629_p1 }
  0x12   :  { %605 = vmatprep.subr.bf16.mxu1 %v564_v16 }
  0x13   :  { %p632_p4 = pnand %p631_p3, %p625_p0 }
  0x15   :  { %557 = vmatpush3.bf16.xpose.msk.msra.mxu0 %vm683_vm1, %v552_v10  ;;  %607 = vmatpush3.bf16.msra.mxu1 %v564_v16 }
  0x16   :  { %560 = vmatprep.subr.msk.bf16.mxu0 %vm683_vm1, %v558_v13  ;;  %609 = vmatprep.subr.bf16.mxu1 %v570_v19 }
  0x19   :  { %611 = vmatpush3.bf16.msra.mxu1 %v570_v19 }
  0x1a   :  { %613 = vmatprep.subr.bf16.mxu1 %v576_v22 }
  0x1d   :  { %563 = vmatpush3.bf16.xpose.msk.msra.mxu0 %vm683_vm1, %v558_v13  ;;  %615 = vmatpush3.bf16.msra.mxu1 %v576_v22 }
  0x1e   :  { %566 = vmatprep.subr.msk.bf16.mxu0 %vm683_vm1, %v564_v16  ;;  %617 = vmatprep.subr.bf16.mxu1 %v582_v25 }
  0x21   :  { %619 = vmatpush3.bf16.msra.mxu1 %v582_v25 }
  0x25   :  { %569 = vmatpush3.bf16.xpose.msk.msra.mxu0 %vm683_vm1, %v564_v16 }
  0x26   :  { %572 = vmatprep.subr.msk.bf16.mxu0 %vm683_vm1, %v570_v19 }
  0x2d   :  { %575 = vmatpush3.bf16.xpose.msk.msra.mxu0 %vm683_vm1, %v570_v19 }
  0x2e   :  { %578 = vmatprep.subr.msk.bf16.mxu0 %vm683_vm1, %v576_v22 }
  0x35   :  { %581 = vmatpush3.bf16.xpose.msk.msra.mxu0 %vm683_vm1, %v576_v22 }
  0x36   :  { %584 = vmatprep.subr.msk.bf16.mxu0 %vm683_vm1, %v582_v25 }
  0x3d   :  { %587 = vmatpush3.bf16.xpose.msk.msra.mxu0 %vm683_vm1, %v582_v25 }
  0x44   :  { %497 = vmatmul.mubr.msk.f32.vlgmr.msra.gmra.mrb[0].mxu0 %vm35_vm0, %v16_v26 }
  0x45   :  { %499 = vmatprep.mubr.msk.f32.mxu0 %vm35_vm0, %v17_v27 }
  0x48   :  { %500 = vmatmul.mubr.msk.f32.gmra.mrb[2].mxu0 %vm35_vm0, %v18_v28 }
 0x117   :  { %v498_v30 = vpop.f32.mrb[0].mxu0 }
 0x118   :  { %v162_v31 = vpop.f32.mrb[1].mxu0  ;;  %v196_v36 = vsub.f32 %v414_v29, %v498_v30 }
 0x119   :  { %v195_v32 = vsub.f32 %v414_v29, %v162_v31 }
 0x11b   :  { %199 = vmin.xlane.f32.xlu0 %v195_v32  ;;  %v501_v34 = vpop.f32.mrb[2].mxu0 }
 0x11c   :  { %v172_v35 = vpop.f32.mrb[3].mxu0  ;;  %v198_v38 = vsub.f32 %v415_v33, %v501_v34 }
 0x11d   :  { %v197_v37 = vsub.f32 %v415_v33, %v172_v35 }
 0x11f   :  { %201 = vmin.xlane.f32.xlu0 %v196_v36  ;;  %203 = vmin.xlane.f32.xlu1 %v197_v37 }
 0x123   :  { %205 = vmin.xlane.f32.xlu1 %v198_v38 }
 0x1a8   :  { %v200_v41 = vpop.xlane.xlu0 %199 }
 0x1a9   :  { %vm209_vm2 = vcmp.le.f32.partialorder %v195_v32, %v200_v41 }
 0x1aa   :  { %v213_v42 = vsel %vm209_vm2, %v780_v40, 128 }
 0x1ab   :  { %v218_v43 = vshra.s32 %v213_v42, 16  ;;  %v217_v57 = vand.u32 65535, %v213_v42 }
 0x1ac   :  { %v202_v44 = vpop.xlane.xlu0 %201  ;;  %v204_v45 = vpop.xlane.xlu1 %203 }
 0x1ad   :  { %vm210_vm3 = vcmp.le.f32.partialorder %v196_v36, %v202_v44  ;;  %vm211_vm4 = vcmp.le.f32.partialorder %v197_v37, %v204_v45  ;;  %v220_v46 = vcvt.s32.f32 %v218_v43  ;;  %v219_v61 = vcvt.s32.f32 %v217_v57 }
 0x1ae   :  { %v214_v47 = vsel %vm210_vm3, %v780_v40, 128  ;;  %v215_v48 = vsel %vm211_vm4, %v780_v40, 128 }
 0x1af   :  { %221 = vmin.xlane.f32.xlu0 %v220_v46  ;;  %v232_v49 = vshra.s32 %v214_v47, 16  ;;  %v246_v50 = vshra.s32 %v215_v48, 16  ;;  %v231_v58 = vand.u32 65535, %v214_v47  ;;  %v245_v59 = vand.u32 65535, %v215_v48 }
 0x1b0   :  { %v206_v51 = vpop.xlane.xlu1 %205 }
 0x1b1   :  { %vm212_vm5 = vcmp.le.f32.partialorder %v198_v38, %v206_v51  ;;  %v234_v52 = vcvt.s32.f32 %v232_v49  ;;  %v248_v53 = vcvt.s32.f32 %v246_v50  ;;  %v247_v2 = vcvt.s32.f32 %v245_v59 }
 0x1b2   :  { %v216_v54 = vsel %vm212_vm5, %v780_v40, 128  ;;  %v233_v3 = vcvt.s32.f32 %v231_v58 }
 0x1b3   :  { %235 = vmin.xlane.f32.xlu1 %v234_v52  ;;  %249 = vmin.xlane.f32.xlu0 %v248_v53  ;;  %v260_v55 = vshra.s32 %v216_v54, 16  ;;  %v259_v63 = vand.u32 65535, %v216_v54 }
 0x1b5   :  { %v262_v56 = vcvt.s32.f32 %v260_v55  ;;  %v261_v7 = vcvt.s32.f32 %v259_v63 }
 0x1b7   :  { %263 = vmin.xlane.f32.xlu1 %v262_v56 }
 0x23c   :  { %v222_v60 = vpop.xlane.xlu0 %221 }
 0x23d   :  { %vm223_vm6 = vcmp.eq.f32.partialorder %v220_v46, %v222_v60  ;;  %v228_v9 = vcvt.f32.s32 %v222_v60 }
 0x23e   :  { %v224_v62 = vsel %vm223_vm6, %v219_v61, inf }
 0x23f   :  { %225 = vmin.xlane.f32.xlu0 %v224_v62  ;;  %v229_v13 = vshll.u32 %v228_v9, 16 }
 0x240   :  { %v250_v0 = vpop.xlane.xlu0 %249  ;;  %v236_v1 = vpop.xlane.xlu1 %235 }
 0x241   :  { %vm251_vm7 = vcmp.eq.f32.partialorder %v248_v53, %v250_v0  ;;  %vm237_vm8 = vcmp.eq.f32.partialorder %v234_v52, %v236_v1  ;;  %v256_v10 = vcvt.f32.s32 %v250_v0  ;;  %v242_v11 = vcvt.f32.s32 %v236_v1 }
 0x242   :  { %v252_v4 = vsel %vm251_vm7, %v247_v2, inf  ;;  %v238_v5 = vsel %vm237_vm8, %v233_v3, inf }
 0x243   :  { %253 = vmin.xlane.f32.xlu0 %v252_v4  ;;  %239 = vmin.xlane.f32.xlu1 %v238_v5  ;;  %v257_v16 = vshll.u32 %v256_v10, 16  ;;  %v243_v17 = vshll.u32 %v242_v11, 16 }
 0x244   :  { %v264_v6 = vpop.xlane.xlu1 %263 }
 0x245   :  { %vm265_vm9 = vcmp.eq.f32.partialorder %v262_v56, %v264_v6  ;;  %v270_v20 = vcvt.f32.s32 %v264_v6 }
 0x246   :  { %v266_v8 = vsel %vm265_vm9, %v261_v7, inf }
 0x247   :  { %267 = vmin.xlane.f32.xlu1 %v266_v8  ;;  %v271_v27 = vshll.u32 %v270_v20, 16 }
 0x2cc   :  { %v226_v12 = vpop.xlane.xlu0 %225 }
 0x2cd   :  { %v227_v14 = vcvt.f32.s32 %v226_v12 }
 0x2cf   :  { %v230_v15 = vadd.s32 %v229_v13, %v227_v14 }
 0x2d0   :  { %v254_v18 = vpop.xlane.xlu0 %253  ;;  %v240_v19 = vpop.xlane.xlu1 %239 }
 0x2d1   :  { %v255_v21 = vcvt.f32.s32 %v254_v18  ;;  %v241_v22 = vcvt.f32.s32 %v240_v19  ;;  %vm273_vm10 = vcmp.eq.s32.totalorder %v780_v40, %v230_v15 }
 0x2d2   :  { %534 = vmatprep.mubr.msk.f32.mxu1 %vm273_vm10, %v648_v23 }
 0x2d3   :  { %v258_v24 = vadd.s32 %v257_v16, %v255_v21  ;;  %v244_v25 = vadd.s32 %v243_v17, %v241_v22 }
 0x2d4   :  { %v268_v26 = vpop.xlane.xlu1 %267 }
 0x2d5   :  { %v269_v28 = vcvt.f32.s32 %v268_v26  ;;  %vm274_vm11 = vcmp.eq.s32.totalorder %v780_v40, %v244_v25  ;;  %vm275_vm12 = vcmp.eq.s32.totalorder %v780_v40, %v258_v24 }
 0x2d6   :  { %535 = vmatmul.mubr.msk.f32.vlgmr.msra.gmra.mrb[0].mxu1 %vm274_vm11, %v648_v23 }
 0x2d7   :  { %v272_v29 = vadd.s32 %v271_v27, %v269_v28  ;;  %537 = vmatprep.mubr.msk.f32.mxu1 %vm275_vm12, %v648_v23 }
 0x2d9   :  { %vm276_vm13 = vcmp.eq.s32.totalorder %v780_v40, %v272_v29 }
 0x2da   :  { %538 = vmatmul.mubr.msk.f32.gmra.mrb[2].mxu1 %vm276_vm13, %v648_v23 }
 0x3a9   :  { %v536_v30 = vpop.f32.mrb[0].mxu1 }
 0x3aa   :  { %v371_v31 = vmul.f32 0.5, %v536_v30  ;;  %v351_v32 = vpop.f32.mrb[1].mxu1 }
 0x3ab   :  { %v370_v33 = vmul.f32 0.5, %v351_v32 }
 0x3ac   :  { %375 = vst.msk [vmem:[#allocation2 + $0x8] sm:$0xff] %vm35_vm0, %v371_v31 }
 0x3ad   :  { %374 = vst.msk [vmem:[#allocation2] sm:$0xff] %vm35_vm0, %v370_v33  ;;  %v539_v34 = vpop.f32.mrb[2].mxu1 }
 0x3ae   :  { %v373_v35 = vmul.f32 0.5, %v539_v34  ;;  %v361_v36 = vpop.f32.mrb[3].mxu1 }
 0x3af   :  { %v372_v37 = vmul.f32 0.5, %v361_v36 }
 0x3b0   :  { %377 = vst.msk [vmem:[#allocation2 + $0x18] sm:$0xff] %vm35_vm0, %v373_v35 }
 0x3b1   :  { %376 = vst.msk [vmem:[#allocation2 + $0x10] sm:$0xff] %vm35_vm0, %v372_v37 }
 0x3b2   :  { %635 = shalt.err (!%p632_p4)
}
 0x3b3   :  { %s636_s4 = scalar_lea.hbm %s809_s3, 512 }
 0x3b4   :  { %p637_p5 = scmp.ne.s32.totalorder %s809_s3, %s636_s4  ;;  %p640_p6 = scmp.lt.u32.totalorder %s636_s4, %s809_s3 }
 0x3b6   :  { %p642_p7 = pnand %p640_p6, %p637_p5 }
 0x3b8   :  { %645 = shalt.err (!%p642_p7)
}
 0x3b9   :  { %s650_s9 = smov 128   ;;  %s651_s10 = smov 8  }
 0x3ba   :  { %389 = dma.vmem_to_hbm [thread:$0]  %s384_s2, 512, %s809_s3, [#allocation3], %s650_s9, %s650_s9, %s651_s10  }
 0x3bb   :  { %646 = dma.done.wait [#allocation3], 512  }
 0x3bc   :  { %647 = vsyncadd [#allocation3], 4294966784 }
 0x3bd   :  { %393 = vsyncpa [#allocation3], 1 }

</bundles_post_ra>
